<compile_context>
chip_gen: v6e
topology: v6e:2x2x1
jax: 0.10.0
libtpu: 0.0.40
codegen_flags: <defaults>
</compile_context>

<pallas_src>
import functools
import math

import jax
import jax.numpy as jnp
from jax.experimental import pallas as pl
from jax.experimental.pallas import tpu as pltpu


def _label_smoothing_kernel(pred_ref, tgt_ref, out_ref, *,
                            n_total, classes, tile_n,
                            confidence, off_value, row_const):
    """Per-tile: row-wise logsumexp + fused smoothed-KL partial sum."""
    i = pl.program_id(0)

    # Cast AFTER the DMA (HBM traffic stays in the input dtype, e.g. bf16).
    pred = pred_ref[...].astype(jnp.float32)          # (tile_n, C)
    tgt = tgt_ref[...]                                # (tile_n, 1) int32

    # log-softmax building blocks (row-wise lane reductions).
    m = jnp.max(pred, axis=1, keepdims=True)          # (tile_n, 1)
    z = pred - m
    lse = jnp.log(jnp.sum(jnp.exp(z), axis=1, keepdims=True))   # (tile_n, 1)

    # Fused weighted reduce: sum_c true_c * z_c with true_c = sel(conf, off).
    # Single (1, C) lane-iota row; the compare broadcasts it against (tile_n,1).
    cls_row = jax.lax.broadcasted_iota(jnp.int32, (1, classes), 1)
    true_row = jnp.where(cls_row == tgt,
                         jnp.float32(confidence), jnp.float32(off_value))
    wz = jnp.sum(true_row * z, axis=1, keepdims=True)            # (tile_n, 1)

    # Per-row KL: sum_c true*log(true) - sum_c true*logp
    #           = row_const - sum_c true*z + lse   (since sum_c true == 1).
    row_kl = jnp.float32(row_const) - wz + lse                   # (tile_n, 1)

    # Mask rows past the true N (partial last block holds undefined data).
    # Keep this a SELECT so NaN/inf in garbage rows cannot leak through.
    row_ids = jax.lax.broadcasted_iota(jnp.int32, (tile_n, 1), 0) + i * tile_n
    row_kl = jnp.where(row_ids < n_total, row_kl, 0.0)

    tile_sum = jnp.sum(row_kl, axis=0, keepdims=True)            # (1, 1)
    # Lane-dense, (8,128)-aligned output block; wrapper reads element [0, 0].
    out_ref[...] = jnp.broadcast_to(tile_sum, out_ref.shape)


def label_smoothing_loss(pred, target, *, classes, smoothing=0.0,
                         tile_n=None, vmem_limit_bytes=None):
    """Pallas-backed LabelSmoothingLoss.forward. pred: (N, C), target: (N,)."""
    n, c = pred.shape
    assert c == classes
    if smoothing > 0.0:
        assert classes > 1, "smoothing > 0 requires classes > 1"

    confidence = 1.0 - smoothing
    off_value = (smoothing / (classes - 1)) if classes > 1 else 0.0
    # sum_c true*log(true) per row (compile-time constant; 0*log(0) folded to 0).
    row_const = 0.0
    if confidence > 0.0:
        row_const += confidence * math.log(confidence)
    if off_value > 0.0:
        row_const += (classes - 1) * off_value * math.log(off_value)

    # ---- VMEM-aware tile sizing (no row cap, no whole-array padding) -------
    # Budget against the f32 working set and the lane-padded VMEM layout
    # (a (tile_n, C) block with C < 128 still occupies 128 lanes per row).
    try:
        info = pltpu.get_tpu_info()
        vmem_cap = int(getattr(info, "vmem_capacity_bytes", 64 * 1024 * 1024))
    except Exception:  # conservative fallback (v7x-sized)
        vmem_cap = 64 * 1024 * 1024
    if vmem_limit_bytes is None:
        # <= half of physical VMEM: 48 MiB on v5e/v6e (128 MiB), 32 MiB on v7x (64 MiB).
        vmem_limit_bytes = int(min(vmem_cap // 2, 48 * 1024 * 1024))

    if tile_n is None:
        lane_padded_c = ((c + 127) // 128) * 128
        bytes_per_row = lane_padded_c * 4              # f32 working row
        # ~2 double-buffered input blocks + full-size f32 temps + column temps.
        live_factor = 12
        tile_n = vmem_limit_bytes // (bytes_per_row * live_factor)
    tile_n = max(8, (int(tile_n) // 8) * 8)
    tile_n = min(tile_n, ((n + 7) // 8) * 8)           # never larger than ceil8(N)

    num_tiles = pl.cdiv(n, tile_n)                     # partial last block allowed
    tgt2d = target.astype(jnp.int32).reshape(n, 1)

    kernel = functools.partial(
        _label_smoothing_kernel,
        n_total=n, classes=c, tile_n=tile_n,
        confidence=confidence, off_value=off_value, row_const=row_const)

    itemsize = jnp.dtype(pred.dtype).itemsize
    cost = pl.CostEstimate(
        flops=int(8 * n * c),
        transcendentals=int(n * c + n),                # exp per element + log per row
        bytes_accessed=int(n * c * itemsize + n * 4 + num_tiles * 8 * 128 * 4))

    out = pl.pallas_call(
        kernel,
        out_shape=jax.ShapeDtypeStruct((num_tiles * 8, 128), jnp.float32),
        grid_spec=pltpu.PrefetchScalarGridSpec(
            num_scalar_prefetch=0,
            grid=(num_tiles,),
            in_specs=[
                pl.BlockSpec((tile_n, c), lambda i: (i, 0)),
                pl.BlockSpec((tile_n, 1), lambda i: (i, 0)),
            ],
            out_specs=pl.BlockSpec((8, 128), lambda i: (i, 0)),
        ),
        compiler_params=pltpu.CompilerParams(
            dimension_semantics=("parallel",),
            vmem_limit_bytes=vmem_limit_bytes),
        cost_estimate=cost,
    )(pred, tgt2d)

    # One partial sum per tile at out[i*8, 0]; final reduce + GLOBAL-mean divide.
    partials = out[::8, 0]
    return jnp.sum(partials) / jnp.float32(n * c)


def _reference_loss(pred, target, *, classes, smoothing):
    """Plain-JAX reference mirroring the PyTorch module (KLDivLoss 'mean')."""
    logp = jax.nn.log_softmax(pred.astype(jnp.float32), axis=1)
    confidence = 1.0 - smoothing
    off_value = smoothing / (classes - 1)
    true_dist = jnp.full_like(logp, off_value)
    true_dist = true_dist.at[jnp.arange(pred.shape[0]), target].set(confidence)
    kl = jnp.where(true_dist > 0.0,
                   true_dist * (jnp.log(jnp.maximum(true_dist, 1e-30)) - logp),
                   0.0)
    return jnp.sum(kl) / kl.size


if __name__ == "__main__":
    smoothing = 0.1
    key = jax.random.PRNGKey(0)
    k1, k2, k3, k4 = jax.random.split(key, 4)

    # Case 1: small f32 logits, single full tile.
    N, C = 8, 16
    pred = jax.random.normal(k1, (N, C), dtype=jnp.float32)
    target = jax.random.randint(k2, (N,), 0, C, dtype=jnp.int32)
    loss = jax.block_until_ready(
        label_smoothing_loss(pred, target, classes=C, smoothing=smoothing))
    ref = _reference_loss(pred, target, classes=C, smoothing=smoothing)
    assert jnp.allclose(loss, ref, rtol=1e-5, atol=1e-6), (loss, ref)

    # Case 2: bf16 logits in HBM, ragged N, forced multi-tile grid with a
    # partial (masked) last block — no wrapper-side padding.
    N2, C2 = 20, 32
    pred2 = jax.random.normal(k3, (N2, C2), dtype=jnp.float32).astype(jnp.bfloat16)
    target2 = jax.random.randint(k4, (N2,), 0, C2, dtype=jnp.int32)
    loss2 = jax.block_until_ready(
        label_smoothing_loss(pred2, target2, classes=C2, smoothing=smoothing, tile_n=8))
    ref2 = _reference_loss(pred2, target2, classes=C2, smoothing=smoothing)
    assert jnp.allclose(loss2, ref2, rtol=1e-4, atol=1e-5), (loss2, ref2)

    # Case 3: f32, ragged N with auto tile sizing (single partial block, no padding).
    pred3 = pred2.astype(jnp.float32)
    loss3 = jax.block_until_ready(
        label_smoothing_loss(pred3, target2, classes=C2, smoothing=smoothing))
    ref3 = _reference_loss(pred3, target2, classes=C2, smoothing=smoothing)
    assert jnp.allclose(loss3, ref3, rtol=1e-5, atol=1e-6), (loss3, ref3)

    print("KERNEL_OK")
</pallas_src>

<mosaic_0001>
module attributes {stable_mosaic.version = 11 : i64} {
  func.func @_label_smoothing_kernel(%arg0: i32, %arg1: memref<8x16xf32, #tpu.memory_space<vmem>>, %arg2: memref<8x1xi32, #tpu.memory_space<vmem>>, %arg3: memref<8x128xf32, #tpu.memory_space<vmem>>) attributes {dimension_semantics = [#tpu.dimension_semantics<parallel>], iteration_bounds = array<i64: 1>, scalar_prefetch = 0 : i64, scratch_operands = 0 : i64, tpu.core_type = #tpu.core_type<tc>, window_params = [{transform_indices = @transform_0, window_bounds = array<i64: 8, 16>}, {transform_indices = @transform_1, window_bounds = array<i64: 8, 1>}, {transform_indices = @transform_2, window_bounds = array<i64: 8, 128>}]} {
    %c0 = arith.constant 0 : index
    %c0_0 = arith.constant 0 : index
    %0 = vector.load %arg1[%c0, %c0_0] : memref<8x16xf32, #tpu.memory_space<vmem>>, vector<8x16xf32>
    %c0_1 = arith.constant 0 : index
    %c0_2 = arith.constant 0 : index
    %1 = vector.load %arg2[%c0_1, %c0_2] : memref<8x1xi32, #tpu.memory_space<vmem>>, vector<8x1xi32>
    %cst = arith.constant dense<0xFF800000> : vector<8xf32>
    %2 = vector.multi_reduction <maximumf>, %0, %cst [1] : vector<8x16xf32> to vector<8xf32>
    %3 = vector.shape_cast %2 : vector<8xf32> to vector<8x1xf32>
    %4 = vector.broadcast %3 : vector<8x1xf32> to vector<8x16xf32>
    %5 = arith.subf %0, %4 : vector<8x16xf32>
    %6 = math.exp %5 : vector<8x16xf32>
    %cst_3 = arith.constant dense<0.000000e+00> : vector<8xf32>
    %7 = vector.multi_reduction <add>, %6, %cst_3 [1] : vector<8x16xf32> to vector<8xf32>
    %8 = vector.shape_cast %7 : vector<8xf32> to vector<8x1xf32>
    %9 = math.log %8 : vector<8x1xf32>
    %10 = tpu.iota {dimensions = array<i32: 1>} : vector<1x16xi32>
    %11 = vector.broadcast %10 : vector<1x16xi32> to vector<8x16xi32>
    %12 = vector.broadcast %1 : vector<8x1xi32> to vector<8x16xi32>
    %13 = arith.cmpi eq, %11, %12 : vector<8x16xi32>
    %cst_4 = arith.constant 0.899999976 : f32
    %cst_5 = arith.constant 0.00666666683 : f32
    %14 = vector.broadcast %cst_4 : f32 to vector<8x16xf32>
    %15 = vector.broadcast %cst_5 : f32 to vector<8x16xf32>
    %16 = arith.select %13, %14, %15 : vector<8x16xi1>, vector<8x16xf32>
    %17 = arith.mulf %16, %5 : vector<8x16xf32>
    %cst_6 = arith.constant dense<0.000000e+00> : vector<8xf32>
    %18 = vector.multi_reduction <add>, %17, %cst_6 [1] : vector<8x16xf32> to vector<8xf32>
    %19 = vector.shape_cast %18 : vector<8xf32> to vector<8x1xf32>
    %cst_7 = arith.constant -5.958880e-01 : f32
    %20 = vector.broadcast %cst_7 : f32 to vector<8x1xf32>
    %21 = arith.subf %20, %19 : vector<8x1xf32>
    %22 = arith.addf %21, %9 : vector<8x1xf32>
    %23 = tpu.iota {dimensions = array<i32: 0>} : vector<8x1xi32>
    %c8_i32 = arith.constant 8 : i32
    %24 = arith.muli %arg0, %c8_i32 : i32
    %25 = vector.broadcast %24 : i32 to vector<8x1xi32>
    %26 = arith.addi %23, %25 : vector<8x1xi32>
    %c8_i32_8 = arith.constant 8 : i32
    %27 = vector.broadcast %c8_i32_8 : i32 to vector<8x1xi32>
    %28 = arith.cmpi slt, %26, %27 : vector<8x1xi32>
    %cst_9 = arith.constant 0.000000e+00 : f32
    %29 = vector.broadcast %cst_9 : f32 to vector<8x1xf32>
    %30 = arith.select %28, %22, %29 : vector<8x1xi1>, vector<8x1xf32>
    %cst_10 = arith.constant dense<0.000000e+00> : vector<1xf32>
    %31 = vector.multi_reduction <add>, %30, %cst_10 [0] : vector<8x1xf32> to vector<1xf32>
    %32 = vector.shape_cast %31 : vector<1xf32> to vector<1x1xf32>
    %33 = vector.shape_cast %32 : vector<1x1xf32> to vector<1x1xf32>
    %34 = vector.broadcast %33 : vector<1x1xf32> to vector<8x128xf32>
    %c0_11 = arith.constant 0 : index
    %c0_12 = arith.constant 0 : index
    %35 = vector.load %arg3[%c0_11, %c0_12] : memref<8x128xf32, #tpu.memory_space<vmem>>, vector<8x128xf32>
    tpu.vector_store %arg3[%c0_11, %c0_12], %34 {strides = array<i32>} : memref<8x128xf32, #tpu.memory_space<vmem>>, vector<8x128xf32>,
    return
  }
  func.func @transform_0(%arg0: i32) -> (i32, i32) {
    %c0_i32 = arith.constant 0 : i32
    %c0_i32_0 = arith.constant 0 : i32
    return %arg0, %c0_i32 : i32, i32
  }
  func.func @transform_1(%arg0: i32) -> (i32, i32) {
    %c0_i32 = arith.constant 0 : i32
    %c0_i32_0 = arith.constant 0 : i32
    return %arg0, %c0_i32 : i32, i32
  }
  func.func @transform_2(%arg0: i32) -> (i32, i32) {
    %c0_i32 = arith.constant 0 : i32
    %c0_i32_0 = arith.constant 0 : i32
    return %arg0, %c0_i32 : i32, i32
  }
}

</mosaic_0001>

<bundles_post_ra>
// kernel: tpu_custom_call.1
= control target key start
LH: loop header
LB: loop body
LE: loop exit
PB: predicated region body
PF: predicated region fallthrough
CT: control target
= control target key end

     0   :  { %vm14_vm0 = vcmask 130048   ;;  %s127_s0 = inlined_call_operand.vmem [shape: f32[8,16], index: 0, kind: input, shape index: {}]   ;;  %s128_s1 = inlined_call_operand.vmem [shape: s32[8,1], index: 1, kind: input, shape index: {}]   ;;  %s129_s2 = inlined_call_operand.hbm [shape: f32[8,128], index: 2, kind: output, shape index: {}]  }
   0x1   :  { %v12_v0 = vld [vmem:[%s127_s0] sm:$0xff] }
   0x2   :  { %7 = vsyncpa [#allocation3], 0  ;;  %v15_v1 = vsel %vm14_vm0, %v12_v0, -inf  ;;  %v97_v2 = vmov 0   ;;  %v13_v3 = vld [vmem:[%s128_s1] sm:$0xff]  ;;  %v26_v7 = vlaneseq  ;;  %s99_s0 = smov [#allocation2]  }
   0x3   :  { %70 = vset.pattern.permute.xlu0 %v97_v2  ;;  %v98_v10 = vmov 0.006666667   ;;  %s59_s1 = sshll.u32 %s99_s0, 4  ;;  %s60_s1 = int_to_ptr.vmem [resolvable:$true] %s59_s1 }
   0x4   :  { %16 = vmax.xlane.f32.xlu0 %v15_v1  ;;  %v27_v8 = vand.u32 127, %v26_v7  ;;  %s75_s13 = scalar_lea.vmem %s60_s1, 128  ;;  %p80_p1 = scmp.lt.s32.totalorder %s60_s1, %s60_s1 }
   0x5   :  { %p76_p0 = scmp.ne.s32.totalorder %s60_s1, %s75_s13  ;;  %p81_p2 = scmp.lt.s32.totalorder %s75_s13, %s75_s13 }
   0x7   :  { %p82_p3 = por %p81_p2, %p80_p1 }
   0x9   :  { %p83_p4 = pnand %p82_p3, %p76_p0 }
  0x1a   :  { %29 = vperm.xlu0 %70, %v13_v3  }
  0x8d   :  { %v17_v4 = vpop.xlane.xlu0 %16 }
  0x8e   :  { %v18_v5 = vsub.f32 %v12_v0, %v17_v4 }
  0x90   :  { %v19_v6 = vmul.f32 1.442695, %v18_v5 }
  0x92   :  { %71 = vpow2.f32 %v19_v6 }
  0x95   :  { %v30_v9 = vpop.permute.xlu0 %29 }
  0x96   :  { %vm31_vm1 = vcmp.eq.s32.totalorder %v27_v8, %v30_v9 }
  0x97   :  { %v32_v11 = vsel %vm31_vm1, 0.9, %v98_v10 }
  0x98   :  { %v33_v14 = vmul.f32 %v32_v11, %v18_v5 }
  0x9a   :  { %v34_v15 = vsel %vm14_vm0, %v33_v14, 0.0 }
  0x9f   :  { %v72_v12 = vpop.eup %71 }
  0xa0   :  { %v21_v13 = vsel %vm14_vm0, %v72_v12, 0.0 }
  0xa1   :  { %22 = vadd.xlane.f32.xlu1 %v21_v13 }
  0xa5   :  { %35 = vadd.xlane.f32.xlu1 %v34_v15 }
 0x12a   :  { %v23_v16 = vpop.xlane.xlu1 %22 }
 0x12b   :  { %73 = vlog2.f32 %v23_v16 }
 0x12e   :  { %v36_v17 = vpop.xlane.xlu1 %35 }
 0x12f   :  { %v37_v20 = vsub.f32 -0.595888, %v36_v17 }
 0x138   :  { %v74_v18 = vpop.eup %73 }
 0x139   :  { %v25_v19 = vmul.f32 0.6931472, %v74_v18 }
 0x13b   :  { %v38_v21 = vadd.f32 %v37_v20, %v25_v19 }
 0x13d   :  { %v46_v22 = vrot.slane %v38_v21, 4 }
 0x13f   :  { %v47_v23 = vadd.f32 %v46_v22, %v38_v21 }
 0x141   :  { %v48_v24 = vrot.slane %v47_v23, 2 }
 0x143   :  { %v49_v25 = vadd.f32 %v48_v24, %v47_v23 }
 0x145   :  { %v50_v26 = vrot.slane %v49_v25, 1 }
 0x147   :  { %v51_v27 = vadd.f32 %v50_v26, %v49_v25 }
 0x149   :  { %52 = vst [vmem:[#allocation2] sm:$0xff] %v51_v27 }
 0x14a   :  { %86 = shalt.err (!%p83_p4)
}
 0x14b   :  { %62 = dma.vmem_to_hbm [thread:$0]  %s60_s1, 128, %s129_s2, [#allocation3]  }
 0x14c   :  { %95 = dma.done.wait [#allocation3], 128  }
 0x14d   :  { %96 = vsyncadd [#allocation3], 4294967168 }
 0x14e   :  { %66 = vsyncpa [#allocation3], 1 }

</bundles_post_ra>
